<compile_context>
chip_gen: v7x
topology: tpu7x:2x2x1
jax: 0.10.0
libtpu: 0.0.40
codegen_flags: <defaults>
</compile_context>

<pallas_src>
import jax
import jax.numpy as jnp
from jax.experimental import pallas as pl
from jax.experimental.pallas import tpu as pltpu


_COLS = 512                          # block width: big multiple of 128 lanes
_TOTAL_LIVE_VMEM_BUDGET = 48 << 20   # 3 arrays x 2 buffers x block, fits v7x 64 MiB
_VMEM_LIMIT_BYTES = 56 << 20         # explicit scoped-VMEM limit (safe on v5e/v6e/v7x)


def _round_up(x, m):
    return ((x + m - 1) // m) * m


def _row_align(*dtypes):
    # Sublane packing: f32 -> 8, bf16/f16 -> 16, int8/fp8 -> 32 rows.
    min_bytes = min(jnp.dtype(d).itemsize for d in dtypes)
    return 8 * max(1, 4 // max(1, min_bytes))


def _plan(n, itemsize_sum, row_align):
    """Pick (cols, padded_rows, tile_rows, grid) for a flat length n."""
    cols = _COLS
    rows_needed = _round_up(pl.cdiv(n, cols), row_align)
    # Largest row tile whose double-buffered live blocks stay within budget.
    max_rows = _TOTAL_LIVE_VMEM_BUDGET // (2 * itemsize_sum * cols)
    max_rows = max(row_align, (max_rows // row_align) * row_align)
    tile_rows = min(max_rows, rows_needed)
    grid = pl.cdiv(rows_needed, tile_rows)
    # v7x megacore: the ("parallel",) grid is sharded across 2 TensorCores;
    # prefer an even number of grid steps to avoid a tail imbalance.
    if grid > 2 and grid % 2 == 1:
        alt = _round_up(pl.cdiv(rows_needed, grid + 1), row_align)
        if row_align <= alt <= tile_rows and pl.cdiv(rows_needed, alt) % 2 == 0:
            tile_rows = alt
            grid = pl.cdiv(rows_needed, tile_rows)
    rows = grid * tile_rows
    return cols, rows, tile_rows, grid


def _as_slab(x, rows, cols):
    """Flatten x and zero-pad to a (rows, cols) lane-dense slab."""
    n = x.size
    flat = x.reshape(n)
    pad = rows * cols - n
    if pad:
        flat = jnp.pad(flat, (0, pad))
    return flat.reshape(rows, cols)


def _add_kernel(x0_ref, x1_ref, o_ref):
    # Elementwise add on the whole VMEM tile; dtype promotion on the VPU.
    o_ref[...] = x0_ref[...].astype(o_ref.dtype) + x1_ref[...].astype(o_ref.dtype)


def _add_scalar_kernel(s_ref, x_ref, o_ref):
    # s_ref lives in SMEM (shape (1, 1)); broadcast + cast happen on the VPU,
    # so no full-size broadcast temporary is ever written to HBM.
    o_ref[...] = x_ref[...].astype(o_ref.dtype) + s_ref[0, 0].astype(o_ref.dtype)


def _pallas_add_same_shape(x0, x1, out_dtype):
    out_shape = x0.shape
    n = x0.size
    ra = _row_align(x0.dtype, x1.dtype, out_dtype)
    isum = x0.dtype.itemsize + x1.dtype.itemsize + jnp.dtype(out_dtype).itemsize
    cols, rows, tile_rows, grid = _plan(n, isum, ra)

    x0_2d = _as_slab(x0, rows, cols)
    x1_2d = _as_slab(x1, rows, cols)

    out_2d = pl.pallas_call(
        _add_kernel,
        out_shape=jax.ShapeDtypeStruct((rows, cols), out_dtype),
        grid_spec=pltpu.PrefetchScalarGridSpec(
            num_scalar_prefetch=0,
            grid=(grid,),
            in_specs=[
                pl.BlockSpec((tile_rows, cols), lambda i: (i, 0)),
                pl.BlockSpec((tile_rows, cols), lambda i: (i, 0)),
            ],
            out_specs=pl.BlockSpec((tile_rows, cols), lambda i: (i, 0)),
        ),
        compiler_params=pltpu.CompilerParams(
            dimension_semantics=("parallel",),
            vmem_limit_bytes=_VMEM_LIMIT_BYTES,
        ),
    )(x0_2d, x1_2d)

    flat_out = out_2d.reshape(rows * cols)
    if rows * cols != n:
        flat_out = flat_out[:n]
    return flat_out.reshape(out_shape)


def _pallas_add_scalar(x, s, out_dtype):
    """x + s where s is a single element: s stays in SMEM, broadcast in-kernel."""
    out_shape = x.shape
    n = x.size
    ra = _row_align(x.dtype, out_dtype)
    isum = x.dtype.itemsize + jnp.dtype(out_dtype).itemsize
    cols, rows, tile_rows, grid = _plan(n, isum, ra)

    x_2d = _as_slab(x, rows, cols)
    # 32-bit container for the SMEM scalar (covers all sub-32-bit operands).
    s_dtype = (jnp.float32 if jnp.issubdtype(jnp.dtype(out_dtype), jnp.floating)
               else jnp.int32)
    s_smem = s.reshape(1, 1).astype(s_dtype)

    out_2d = pl.pallas_call(
        _add_scalar_kernel,
        out_shape=jax.ShapeDtypeStruct((rows, cols), out_dtype),
        grid_spec=pltpu.PrefetchScalarGridSpec(
            num_scalar_prefetch=0,
            grid=(grid,),
            in_specs=[
                pl.BlockSpec(memory_space=pltpu.MemorySpace.SMEM),
                pl.BlockSpec((tile_rows, cols), lambda i: (i, 0)),
            ],
            out_specs=pl.BlockSpec((tile_rows, cols), lambda i: (i, 0)),
        ),
        compiler_params=pltpu.CompilerParams(
            dimension_semantics=("parallel",),
            vmem_limit_bytes=_VMEM_LIMIT_BYTES,
        ),
    )(s_smem, x_2d)

    flat_out = out_2d.reshape(rows * cols)
    if rows * cols != n:
        flat_out = flat_out[:n]
    return flat_out.reshape(out_shape)


def add(x0, x1):
    """Pallas equivalent of torch.add(x0, x1) (with broadcasting)."""
    x0 = jnp.asarray(x0)
    x1 = jnp.asarray(x1)
    out_shape = jnp.broadcast_shapes(x0.shape, x1.shape)
    out_dtype = jnp.promote_types(x0.dtype, x1.dtype)

    # 1-element operand: keep it in SMEM and broadcast on the VPU instead of
    # materializing a full-size broadcast temporary in HBM.
    if x1.size == 1 and x0.shape == out_shape:
        return _pallas_add_scalar(x0, x1, out_dtype)
    if x0.size == 1 and x1.shape == out_shape:
        return _pallas_add_scalar(x1, x0, out_dtype)

    # General (non-scalar) broadcasting: materialize with XLA, then run the
    # dense same-shape kernel.
    # TODO(synk): handle non-scalar broadcasts (e.g. per-channel bias) inside
    # the kernel via block-0 index maps instead of broadcast_to.
    if x0.shape != out_shape:
        x0 = jnp.broadcast_to(x0, out_shape)
    if x1.shape != out_shape:
        x1 = jnp.broadcast_to(x1, out_shape)
    return _pallas_add_same_shape(x0, x1, out_dtype)


if __name__ == "__main__":
    key = jax.random.PRNGKey(0)
    k0, k1, k2 = jax.random.split(key, 3)
    # NCHW, small shapes: batch=2, channels=4, spatial=16x16
    x0 = jax.random.normal(k0, (2, 4, 16, 16), dtype=jnp.float32)
    x1 = jax.random.normal(k1, (2, 4, 16, 16), dtype=jnp.float32)

    out = jax.block_until_ready(add(x0, x1))
    ref = x0 + x1
    assert out.shape == ref.shape and out.dtype == ref.dtype
    assert jnp.allclose(out, ref, atol=1e-6, rtol=1e-6)

    # Scalar-broadcast path (SMEM scalar, no HBM broadcast temporary).
    s = jax.random.normal(k2, (), dtype=jnp.float32)
    out_s = jax.block_until_ready(add(x0, s))
    ref_s = x0 + s
    assert out_s.shape == ref_s.shape and out_s.dtype == ref_s.dtype
    assert jnp.allclose(out_s, ref_s, atol=1e-6, rtol=1e-6)

    print("KERNEL_OK")
</pallas_src>

<mosaic_0001>
module attributes {stable_mosaic.version = 11 : i64} {
  func.func @_add_kernel(%arg0: i32, %arg1: memref<8x512xf32, #tpu.memory_space<vmem>>, %arg2: memref<8x512xf32, #tpu.memory_space<vmem>>, %arg3: memref<8x512xf32, #tpu.memory_space<vmem>>) attributes {dimension_semantics = [#tpu.dimension_semantics<parallel>], iteration_bounds = array<i64: 1>, scalar_prefetch = 0 : i64, scratch_operands = 0 : i64, tpu.core_type = #tpu.core_type<tc>, window_params = [{transform_indices = @transform_0, window_bounds = array<i64: 8, 512>}, {transform_indices = @transform_1, window_bounds = array<i64: 8, 512>}, {transform_indices = @transform_2, window_bounds = array<i64: 8, 512>}]} {
    %c0 = arith.constant 0 : index
    %c0_0 = arith.constant 0 : index
    %0 = vector.load %arg1[%c0, %c0_0] : memref<8x512xf32, #tpu.memory_space<vmem>>, vector<8x512xf32>
    %c0_1 = arith.constant 0 : index
    %c0_2 = arith.constant 0 : index
    %1 = vector.load %arg2[%c0_1, %c0_2] : memref<8x512xf32, #tpu.memory_space<vmem>>, vector<8x512xf32>
    %2 = arith.addf %0, %1 : vector<8x512xf32>
    %c0_3 = arith.constant 0 : index
    %c0_4 = arith.constant 0 : index
    %3 = vector.load %arg3[%c0_3, %c0_4] : memref<8x512xf32, #tpu.memory_space<vmem>>, vector<8x512xf32>
    tpu.vector_store %arg3[%c0_3, %c0_4], %2 {strides = array<i32>} : memref<8x512xf32, #tpu.memory_space<vmem>>, vector<8x512xf32>,
    return
  }
  func.func @transform_0(%arg0: i32) -> (i32, i32) {
    %c0_i32 = arith.constant 0 : i32
    %c0_i32_0 = arith.constant 0 : i32
    return %arg0, %c0_i32 : i32, i32
  }
  func.func @transform_1(%arg0: i32) -> (i32, i32) {
    %c0_i32 = arith.constant 0 : i32
    %c0_i32_0 = arith.constant 0 : i32
    return %arg0, %c0_i32 : i32, i32
  }
  func.func @transform_2(%arg0: i32) -> (i32, i32) {
    %c0_i32 = arith.constant 0 : i32
    %c0_i32_0 = arith.constant 0 : i32
    return %arg0, %c0_i32 : i32, i32
  }
}

</mosaic_0001>

<bundles_post_ra>
// kernel: tpu_custom_call.1
= control target key start
LH: loop header
LB: loop body
LE: loop exit
PB: predicated region body
PF: predicated region fallthrough
CT: control target
= control target key end

     0   :  { %7 = vsyncpa [#allocation3], 0  ;;  %s197_s0 = inlined_call_operand.hbm [shape: f32[8,512], index: 0, kind: input, shape index: {}]   ;;  %s198_s1 = inlined_call_operand.hbm [shape: f32[8,512], index: 1, kind: input, shape index: {}]   ;;  %s199_s2 = inlined_call_operand.hbm [shape: f32[8,512], index: 2, kind: output, shape index: {}]  }
   0x1   :  { %8 = vsyncpa [#allocation6], 0 }
   0x2   :  { %9 = vsyncpa [#allocation4], 0  ;;  %s143_s9 = smov [#allocation2]   ;;  %s144_s11 = smov [#allocation5]  }
   0x3   :  { %s16_s10 = sshll.u32 %s143_s9, 4  ;;  %s26_s12 = sshll.u32 %s144_s11, 4  ;;  %s17_s10 = int_to_ptr.vmem [resolvable:$true] %s16_s10  ;;  %s27_s12 = int_to_ptr.vmem [resolvable:$true] %s26_s12 }
   0x4   :  { %s71_s15 = scalar_lea.hbm %s197_s0, 512 }
   0x5   :  { %p72_p0 = scmp.ne.s32.totalorder %s197_s0, %s71_s15  ;;  %p75_p1 = scmp.lt.u32.totalorder %s71_s15, %s197_s0 }
   0x7   :  { %p77_p2 = pnand %p75_p1, %p72_p0 }
   0x9   :  { %80 = shalt.err (!%p77_p2)
}
   0xa   :  { %s81_s20 = scalar_lea.vmem %s17_s10, 512  ;;  %p86_p4 = scmp.lt.s32.totalorder %s17_s10, %s17_s10 }
   0xb   :  { %p82_p3 = scmp.ne.s32.totalorder %s17_s10, %s81_s20  ;;  %p87_p5 = scmp.lt.s32.totalorder %s81_s20, %s81_s20 }
   0xd   :  { %p88_p6 = por %p87_p5, %p86_p4 }
   0xf   :  { %p89_p7 = pnand %p88_p6, %p82_p3 }
  0x11   :  { %92 = shalt.err (!%p89_p7)
}
  0x12   :  { %19 = dma.hbm_to_vmem [thread:$0]  %s197_s0, 512, %s17_s10, [#allocation3]  }
  0x13   :  { %s93_s25 = scalar_lea.hbm %s198_s1, 512 }
  0x14   :  { %p94_p8 = scmp.ne.s32.totalorder %s198_s1, %s93_s25  ;;  %p97_p9 = scmp.lt.u32.totalorder %s93_s25, %s198_s1 }
  0x16   :  { %p99_p10 = pnand %p97_p9, %p94_p8 }
  0x18   :  { %102 = shalt.err (!%p99_p10)
}
  0x19   :  { %s103_s30 = scalar_lea.vmem %s27_s12, 512  ;;  %p108_p12 = scmp.lt.s32.totalorder %s27_s12, %s27_s12 }
  0x1a   :  { %p104_p11 = scmp.ne.s32.totalorder %s27_s12, %s103_s30  ;;  %p109_p13 = scmp.lt.s32.totalorder %s103_s30, %s103_s30 }
  0x1c   :  { %p110_p0 = por %p109_p13, %p108_p12 }
  0x1e   :  { %p111_p1 = pnand %p110_p0, %p104_p11 }
  0x20   :  { %114 = shalt.err (!%p111_p1)
}
  0x21   :  { %29 = dma.hbm_to_vmem [thread:$0]  %s198_s1, 512, %s27_s12, [#allocation6]  }
  0x22   :  { %137 = dma.done.wait [#allocation3], 512  }
  0x23   :  { %138 = vsyncadd [#allocation3], 4294966784 }
  0x24   :  { %139 = dma.done.wait [#allocation6], 512  }
  0x25   :  { %140 = vsyncadd [#allocation6], 4294966784  ;;  %v36_v0 = vld [vmem:[#allocation2] sm:$0xff]  ;;  %v37_v2 = vld [vmem:[#allocation2 + $0x8] sm:$0xff]  ;;  %s145_s4 = smov [#allocation7]  }
  0x26   :  { %v40_v1 = vld [vmem:[#allocation5] sm:$0xff]  ;;  %s58_s5 = sshll.u32 %s145_s4, 4  ;;  %v41_v4 = vld [vmem:[#allocation5 + $0x8] sm:$0xff]  ;;  %v38_v5 = vld [vmem:[#allocation2 + $0x10] sm:$0xff]  ;;  %s59_s5 = int_to_ptr.vmem [resolvable:$true] %s58_s5 }
  0x27   :  { %v44_v3 = vadd.f32 %v40_v1, %v36_v0  ;;  %v42_v6 = vld [vmem:[#allocation5 + $0x10] sm:$0xff]  ;;  %v45_v7 = vadd.f32 %v41_v4, %v37_v2  ;;  %v39_v9 = vld [vmem:[#allocation2 + $0x18] sm:$0xff]  ;;  %s115_s1 = scalar_lea.vmem %s59_s5, 512  ;;  %p120_p3 = scmp.lt.s32.totalorder %s59_s5, %s59_s5 }
  0x28   :  { %v46_v8 = vadd.f32 %v42_v6, %v38_v5  ;;  %v43_v10 = vld [vmem:[#allocation5 + $0x18] sm:$0xff]  ;;  %p116_p2 = scmp.ne.s32.totalorder %s59_s5, %s115_s1  ;;  %p121_p4 = scmp.lt.s32.totalorder %s115_s1, %s115_s1 }
  0x29   :  { %48 = vst [vmem:[#allocation7] sm:$0xff] %v44_v3  ;;  %v47_v11 = vadd.f32 %v43_v10, %v39_v9  ;;  %49 = vst [vmem:[#allocation7 + $0x8] sm:$0xff] %v45_v7 }
  0x2a   :  { %50 = vst [vmem:[#allocation7 + $0x10] sm:$0xff] %v46_v8  ;;  %p122_p5 = por %p121_p4, %p120_p3 }
  0x2b   :  { %51 = vst [vmem:[#allocation7 + $0x18] sm:$0xff] %v47_v11 }
  0x2c   :  { %p123_p6 = pnand %p122_p5, %p116_p2 }
  0x2e   :  { %126 = shalt.err (!%p123_p6)
}
  0x2f   :  { %s127_s8 = scalar_lea.hbm %s199_s2, 512 }
  0x30   :  { %p128_p7 = scmp.ne.s32.totalorder %s199_s2, %s127_s8  ;;  %p131_p8 = scmp.lt.u32.totalorder %s127_s8, %s199_s2 }
  0x32   :  { %p133_p9 = pnand %p131_p8, %p128_p7 }
  0x34   :  { %136 = shalt.err (!%p133_p9)
}
  0x35   :  { %61 = dma.vmem_to_hbm [thread:$0]  %s59_s5, 512, %s199_s2, [#allocation4]  }
  0x36   :  { %141 = dma.done.wait [#allocation4], 512  }
  0x37   :  { %142 = vsyncadd [#allocation4], 4294966784 }
  0x38   :  { %65 = vsyncpa [#allocation3], 1 }
  0x39   :  { %66 = vsyncpa [#allocation6], 1 }
  0x3a   :  { %67 = vsyncpa [#allocation4], 1 }

</bundles_post_ra>
